<compile_context>
chip_gen: v7x
topology: tpu7x:2x2x1
jax: 0.10.0
libtpu: 0.0.40
codegen_flags: <defaults>
</compile_context>

<pallas_src>
import functools
import math

import jax
import jax.numpy as jnp
from jax import lax
from jax.experimental import pallas as pl
from jax.experimental.pallas import tpu as pltpu


def transformer_block_kernel(x_ref, small_ref, wqkv_ref, bqkv_ref, wout_ref,
                             w1_ref, b1_ref, w2_ref, o_ref,
                             *, n_heads: int, ln_eps: float = 1e-5):
    f32 = jnp.float32
    x = x_ref[0].astype(f32)                          # (S, H) — one batch element
    S, H = x.shape
    d = H // n_heads
    scale = 1.0 / math.sqrt(d)

    # Packed small params: rows = [ln1_g, ln1_b, ln2_g, ln2_b, bout, b2].
    small = small_ref[...].astype(f32)                # (6, H)
    ln1_g, ln1_b = small[0:1], small[1:2]
    ln2_g, ln2_b = small[2:3], small[3:4]
    bout, b2 = small[4:5], small[5:6]

    def layer_norm(v, g, b):
        mu = jnp.mean(v, axis=-1, keepdims=True)
        c = v - mu
        var = jnp.mean(c * c, axis=-1, keepdims=True)
        return c * lax.rsqrt(var + ln_eps) * g + b

    # ---------------- attention branch ----------------
    xn = layer_norm(x, ln1_g, ln1_b)                                  # (S, H) f32

    # Single lane-dense QKV projection: (S,H) @ (H,3H) on the MXU, f32 accumulate.
    wqkv = wqkv_ref[...]
    mm = wqkv.dtype                                   # matmul dtype (bf16 or f32)
    qkv = jnp.dot(xn.astype(mm), wqkv,
                  preferred_element_type=f32) + bqkv_ref[...]         # (S, 3H) f32

    # Head split: one 2-D transpose, then tile-row-aligned leading-dim reshape.
    qkv_t = qkv.T.reshape(3, n_heads, d, S)                           # (3, nh, d, S)
    qT, kT, vT = qkv_t[0], qkv_t[1], qkv_t[2]                         # (nh, d, S) each
    q = jnp.swapaxes(qT, 1, 2)                                        # (nh, S, d)

    # Batched scores: canonical (nh, S, d) x (nh, d, S) matmul.
    scores = jnp.einsum("hqd,hdk->hqk", q.astype(mm), kT.astype(mm),
                        preferred_element_type=f32) * scale           # (nh, S, S) f32

    # Causal mask applied BEFORE the row max (no zero-denominator path),
    # built from a single (S,S) iota pair broadcast over heads.
    row = lax.broadcasted_iota(jnp.int32, (S, S), 0)
    col = lax.broadcasted_iota(jnp.int32, (S, S), 1)
    causal = col <= row                                               # (S, S) bool
    scores = jnp.where(causal[None, :, :], scores, f32(-1e30))

    m = jnp.max(scores, axis=-1, keepdims=True)
    p = jnp.exp(scores - m)                           # masked entries underflow to 0
    denom = jnp.sum(p, axis=-1, keepdims=True)
    p = p * pl.reciprocal(denom, approx=True)                         # EUP slot

    # Context directly in transposed (nh, d, S) layout -> heads merge back to
    # (S, H) with a tile-aligned reshape + one 2-D transpose.
    ctxT = jnp.einsum("hdk,hqk->hdq", vT.astype(mm), p.astype(mm),
                      preferred_element_type=f32)                     # (nh, d, S)
    ctx = ctxT.reshape(H, S).T                                        # (S, H), torch concat order

    # Output projection fused with the head sum: single (S,H)x(H,H) matmul, K=H.
    wout = wout_ref[...]
    attn = jnp.dot(ctx.astype(mm), wout, preferred_element_type=f32) + bout
    x1 = x + attn                                                     # residual 1

    # ---------------- MLP branch ----------------
    xn2 = layer_norm(x1, ln2_g, ln2_b)
    w1 = w1_ref[...]
    h = jnp.dot(xn2.astype(w1.dtype), w1, preferred_element_type=f32) + b1_ref[...]
    # TODO(synk): nn.GELU() defaults to the exact erf form; the tanh
    # approximation (max deviation ~1e-3) is used here and in the reference
    # since erf lowering on Mosaic is not guaranteed.
    h = 0.5 * h * (1.0 + jnp.tanh(0.7978845608028654 * (h + 0.044715 * h * h * h)))
    w2 = w2_ref[...]
    mlp = jnp.dot(h.astype(w2.dtype), w2, preferred_element_type=f32) + b2

    o_ref[0] = (x1 + mlp).astype(o_ref.dtype)                         # residual 2


def transformer_block_forward(x, params, n_heads, *, matmul_dtype=jnp.bfloat16):
    """x: (B, S, H).  Linear weights in params are (in, out); biases are 1-D.

    matmul_dtype: dtype fed to the MXU (weights are cast in the wrapper so the
    weight DMA is narrow too); all element-wise math stays float32.
    """
    B, S, H = x.shape
    F = 4 * H
    d = H // n_heads
    mm = jnp.dtype(matmul_dtype)
    f32 = jnp.float32

    # ---- parameter re-layouts (done once, outside the kernel, by XLA) ----
    # One packed (6, H) slab instead of six (1, H) DMAs.
    small = jnp.stack(
        [params["ln1_g"], params["ln1_b"], params["ln2_g"], params["ln2_b"],
         params["bout"], params["b2"]], axis=0).astype(f32)            # (6, H)
    wqkv = params["wqkv"].astype(mm)                                   # (H, 3H) lane-dense
    bqkv = params["bqkv"].reshape(1, 3 * H).astype(f32)                # (1, 3H)
    wout = params["wout"].astype(mm)                                   # (H, H)
    w1 = params["w1"].astype(mm)                                       # (H, F)
    b1 = params["b1"].reshape(1, F).astype(f32)                        # (1, F)
    w2 = params["w2"].astype(mm)                                       # (F, H)

    kernel = functools.partial(transformer_block_kernel, n_heads=n_heads)

    # Advisory cost estimate for XLA's scheduler.
    flops = B * (2 * S * H * 3 * H            # qkv projection
                 + 4 * n_heads * S * S * d    # scores + probs@V
                 + 2 * S * H * H              # output projection
                 + 4 * S * H * F)             # fc1 + fc2
    transcendentals = B * (n_heads * S * S    # exp
                           + S * F            # tanh (gelu)
                           + 2 * S            # rsqrt (layernorms)
                           + n_heads * S)     # reciprocal
    weight_bytes = sum(int(a.size) * a.dtype.itemsize
                       for a in (small, wqkv, bqkv, wout, w1, b1, w2))
    bytes_accessed = weight_bytes + 2 * int(x.size) * x.dtype.itemsize

    # VMEM budget sized to the actual resident set (double-buffered inputs +
    # activation headroom), floored/capped so toy and realistic shapes are safe.
    resident = 2 * (weight_bytes + 2 * S * H * 4)
    vmem_limit = int(min(max(4 * resident + (16 << 20), 32 << 20), 64 << 20))

    full2 = lambda b: (0, 0)
    return pl.pallas_call(
        kernel,
        out_shape=jax.ShapeDtypeStruct((B, S, H), x.dtype),
        grid_spec=pltpu.PrefetchScalarGridSpec(
            num_scalar_prefetch=0,
            grid=(B,),
            in_specs=[
                pl.BlockSpec((1, S, H), lambda b: (b, 0, 0)),   # x
                pl.BlockSpec((6, H), full2),                    # packed LN/bias params
                pl.BlockSpec((H, 3 * H), full2),                # Wqkv
                pl.BlockSpec((1, 3 * H), full2),                # bqkv
                pl.BlockSpec((H, H), full2),                    # Wout
                pl.BlockSpec((H, F), full2),                    # W fc1
                pl.BlockSpec((1, F), full2),                    # b fc1
                pl.BlockSpec((F, H), full2),                    # W fc2
            ],
            out_specs=pl.BlockSpec((1, S, H), lambda b: (b, 0, 0)),
        ),
        compiler_params=pltpu.CompilerParams(
            dimension_semantics=("parallel",),
            vmem_limit_bytes=vmem_limit),
        cost_estimate=pl.CostEstimate(flops=flops,
                                      transcendentals=transcendentals,
                                      bytes_accessed=bytes_accessed),
    )(x, small, wqkv, bqkv, wout, w1, b1, w2)


def transformer_block_ref(x, params, n_heads):
    """Pure-JAX reference matching the PyTorch TransformerBlock forward."""
    B, S, H = x.shape
    d = H // n_heads

    def ln(v, g, b):
        mu = v.mean(-1, keepdims=True)
        var = ((v - mu) ** 2).mean(-1, keepdims=True)
        return (v - mu) / jnp.sqrt(var + 1e-5) * g + b

    # attention
    xn = ln(x, params["ln1_g"], params["ln1_b"])
    qkv = xn @ params["wqkv"] + params["bqkv"]
    q, k, v = jnp.split(qkv, 3, axis=-1)
    q = q.reshape(B, S, n_heads, d).transpose(0, 2, 1, 3)
    k = k.reshape(B, S, n_heads, d).transpose(0, 2, 1, 3)
    v = v.reshape(B, S, n_heads, d).transpose(0, 2, 1, 3)
    scores = jnp.einsum("bhqd,bhkd->bhqk", q, k) / math.sqrt(d)
    mask = jnp.tril(jnp.ones((S, S), dtype=bool))
    scores = jnp.where(mask, scores, -jnp.inf)
    probs = jax.nn.softmax(scores, axis=-1)
    ctx = jnp.einsum("bhqk,bhkd->bhqd", probs, v)
    ctx = ctx.transpose(0, 2, 1, 3).reshape(B, S, H)
    x1 = x + (ctx @ params["wout"] + params["bout"])

    # mlp
    xn2 = ln(x1, params["ln2_g"], params["ln2_b"])
    h = xn2 @ params["w1"] + params["b1"]
    h = jax.nn.gelu(h, approximate=True)   # tanh form, same as the kernel
    mlp = h @ params["w2"] + params["b2"]
    return x1 + mlp


if __name__ == "__main__":
    # Small config consistent with the module: n_embd=32, n_head=4, seq=8, batch=2.
    B, S, H, n_heads = 2, 8, 32, 4
    F = 4 * H

    key = jax.random.PRNGKey(0)
    ks = jax.random.split(key, 14)

    x = jax.random.normal(ks[0], (B, S, H), dtype=jnp.float32)

    bH = 1.0 / math.sqrt(H)
    bF = 1.0 / math.sqrt(F)
    params = dict(
        ln1_g=1.0 + 0.1 * jax.random.normal(ks[1], (H,), jnp.float32),
        ln1_b=0.1 * jax.random.normal(ks[2], (H,), jnp.float32),
        wqkv=jax.random.uniform(ks[3], (H, 3 * H), jnp.float32, -bH, bH),
        bqkv=jax.random.uniform(ks[4], (3 * H,), jnp.float32, -bH, bH),
        wout=jax.random.uniform(ks[5], (H, H), jnp.float32, -bH, bH),
        bout=jax.random.uniform(ks[6], (H,), jnp.float32, -bH, bH),
        ln2_g=1.0 + 0.1 * jax.random.normal(ks[7], (H,), jnp.float32),
        ln2_b=0.1 * jax.random.normal(ks[8], (H,), jnp.float32),
        w1=jax.random.uniform(ks[9], (H, F), jnp.float32, -bH, bH),
        b1=jax.random.uniform(ks[10], (F,), jnp.float32, -bH, bH),
        w2=jax.random.uniform(ks[11], (F, H), jnp.float32, -bF, bF),
        b2=jax.random.uniform(ks[12], (H,), jnp.float32, -bF, bF),
    )

    ref = transformer_block_ref(x, params, n_heads)

    # f32 matmul path: tight parity with the f32 PyTorch module numerics.
    out_f32 = jax.block_until_ready(
        transformer_block_forward(x, params, n_heads, matmul_dtype=jnp.float32))
    assert out_f32.shape == (B, S, H)
    err32 = float(jnp.max(jnp.abs(out_f32 - ref)))
    assert jnp.allclose(out_f32, ref, atol=2e-3, rtol=2e-3), \
        f"f32 mismatch vs reference, max|diff|={err32}"

    # bf16 matmul path (perf-review item: MXU-friendly operands, f32 accumulate,
    # element-wise math still f32).  Looser tolerance for the reduced precision.
    out_bf16 = jax.block_until_ready(
        transformer_block_forward(x, params, n_heads, matmul_dtype=jnp.bfloat16))
    errbf = float(jnp.max(jnp.abs(out_bf16 - ref)))
    assert jnp.allclose(out_bf16, ref, atol=1e-1, rtol=1e-1), \
        f"bf16 mismatch vs reference, max|diff|={errbf}"

    print("KERNEL_OK")
</pallas_src>

<mosaic_0001>
module attributes {stable_mosaic.version = 11 : i64} {
  func.func @transformer_block_kernel(%arg0: i32, %arg1: memref<1x8x32xf32, #tpu.memory_space<vmem>>, %arg2: memref<6x32xf32, #tpu.memory_space<vmem>>, %arg3: memref<32x96xf32, #tpu.memory_space<vmem>>, %arg4: memref<1x96xf32, #tpu.memory_space<vmem>>, %arg5: memref<32x32xf32, #tpu.memory_space<vmem>>, %arg6: memref<32x128xf32, #tpu.memory_space<vmem>>, %arg7: memref<1x128xf32, #tpu.memory_space<vmem>>, %arg8: memref<128x32xf32, #tpu.memory_space<vmem>>, %arg9: memref<1x8x32xf32, #tpu.memory_space<vmem>>) attributes {dimension_semantics = [#tpu.dimension_semantics<parallel>], iteration_bounds = array<i64: 2>, scalar_prefetch = 0 : i64, scratch_operands = 0 : i64, tpu.core_type = #tpu.core_type<tc>, window_params = [{transform_indices = @transform_0, window_bounds = array<i64: 1, 8, 32>}, {pipeline_mode = #tpu.pipeline_mode<synchronous>, transform_indices = @transform_1, window_bounds = array<i64: 6, 32>}, {pipeline_mode = #tpu.pipeline_mode<synchronous>, transform_indices = @transform_2, window_bounds = array<i64: 32, 96>}, {pipeline_mode = #tpu.pipeline_mode<synchronous>, transform_indices = @transform_3, window_bounds = array<i64: 1, 96>}, {pipeline_mode = #tpu.pipeline_mode<synchronous>, transform_indices = @transform_4, window_bounds = array<i64: 32, 32>}, {pipeline_mode = #tpu.pipeline_mode<synchronous>, transform_indices = @transform_5, window_bounds = array<i64: 32, 128>}, {pipeline_mode = #tpu.pipeline_mode<synchronous>, transform_indices = @transform_6, window_bounds = array<i64: 1, 128>}, {pipeline_mode = #tpu.pipeline_mode<synchronous>, transform_indices = @transform_7, window_bounds = array<i64: 128, 32>}, {transform_indices = @transform_8, window_bounds = array<i64: 1, 8, 32>}]} {
    %c0 = arith.constant 0 : index
    %c0_0 = arith.constant 0 : index
    %c0_1 = arith.constant 0 : index
    %0 = vector.load %arg1[%c0, %c0_0, %c0_1] : memref<1x8x32xf32, #tpu.memory_space<vmem>>, vector<1x8x32xf32>
    %1 = vector.shape_cast %0 : vector<1x8x32xf32> to vector<8x32xf32>
    %c0_2 = arith.constant 0 : index
    %c0_3 = arith.constant 0 : index
    %2 = vector.load %arg2[%c0_2, %c0_3] : memref<6x32xf32, #tpu.memory_space<vmem>>, vector<6x32xf32>
    %3 = vector.extract_strided_slice %2 {offsets = [0, 0], sizes = [1, 32], strides = [1, 1]} : vector<6x32xf32> to vector<1x32xf32>
    %4 = vector.extract_strided_slice %2 {offsets = [1, 0], sizes = [1, 32], strides = [1, 1]} : vector<6x32xf32> to vector<1x32xf32>
    %5 = vector.extract_strided_slice %2 {offsets = [2, 0], sizes = [1, 32], strides = [1, 1]} : vector<6x32xf32> to vector<1x32xf32>
    %6 = vector.extract_strided_slice %2 {offsets = [3, 0], sizes = [1, 32], strides = [1, 1]} : vector<6x32xf32> to vector<1x32xf32>
    %7 = vector.extract_strided_slice %2 {offsets = [4, 0], sizes = [1, 32], strides = [1, 1]} : vector<6x32xf32> to vector<1x32xf32>
    %8 = vector.extract_strided_slice %2 {offsets = [5, 0], sizes = [1, 32], strides = [1, 1]} : vector<6x32xf32> to vector<1x32xf32>
    %cst = arith.constant dense<0.000000e+00> : vector<8xf32>
    %9 = vector.multi_reduction <add>, %1, %cst [1] : vector<8x32xf32> to vector<8xf32>
    %10 = vector.shape_cast %9 : vector<8xf32> to vector<8x1xf32>
    %cst_4 = arith.constant 3.200000e+01 : f32
    %11 = vector.broadcast %cst_4 : f32 to vector<8x1xf32>
    %12 = arith.divf %10, %11 : vector<8x1xf32>
    %13 = vector.broadcast %12 : vector<8x1xf32> to vector<8x32xf32>
    %14 = arith.subf %1, %13 : vector<8x32xf32>
    %15 = arith.mulf %14, %14 : vector<8x32xf32>
    %cst_5 = arith.constant dense<0.000000e+00> : vector<8xf32>
    %16 = vector.multi_reduction <add>, %15, %cst_5 [1] : vector<8x32xf32> to vector<8xf32>
    %17 = vector.shape_cast %16 : vector<8xf32> to vector<8x1xf32>
    %cst_6 = arith.constant 3.200000e+01 : f32
    %18 = vector.broadcast %cst_6 : f32 to vector<8x1xf32>
    %19 = arith.divf %17, %18 : vector<8x1xf32>
    %cst_7 = arith.constant 9.99999974E-6 : f32
    %20 = vector.broadcast %cst_7 : f32 to vector<8x1xf32>
    %21 = arith.addf %19, %20 : vector<8x1xf32>
    %22 = math.rsqrt %21 : vector<8x1xf32>
    %23 = vector.broadcast %22 : vector<8x1xf32> to vector<8x32xf32>
    %24 = arith.mulf %14, %23 : vector<8x32xf32>
    %25 = vector.broadcast %3 : vector<1x32xf32> to vector<8x32xf32>
    %26 = arith.mulf %24, %25 : vector<8x32xf32>
    %27 = vector.broadcast %4 : vector<1x32xf32> to vector<8x32xf32>
    %28 = arith.addf %26, %27 : vector<8x32xf32>
    %c0_8 = arith.constant 0 : index
    %c0_9 = arith.constant 0 : index
    %29 = vector.load %arg3[%c0_8, %c0_9] : memref<32x96xf32, #tpu.memory_space<vmem>>, vector<32x96xf32>
    %cst_10 = arith.constant dense<0.000000e+00> : vector<8x96xf32>
    %30 = tpu.matmul %28, %29, %cst_10 {dimension_numbers = #tpu.dot_dimension_numbers<[1], [0], [0], [1], [0, 0, 1, 1], [], []>} : vector<8x32xf32>, vector<32x96xf32>, vector<8x96xf32> -> vector<8x96xf32>
    %c0_11 = arith.constant 0 : index
    %c0_12 = arith.constant 0 : index
    %31 = vector.load %arg4[%c0_11, %c0_12] : memref<1x96xf32, #tpu.memory_space<vmem>>, vector<1x96xf32>
    %32 = vector.broadcast %31 : vector<1x96xf32> to vector<8x96xf32>
    %33 = arith.addf %30, %32 : vector<8x96xf32>
    %34 = tpu.transpose %33, [1, 0] : vector<8x96xf32> -> vector<96x8xf32>
    %35 = vector.shape_cast %34 : vector<96x8xf32> to vector<3x4x8x8xf32>
    %36 = vector.extract_strided_slice %35 {offsets = [0, 0, 0, 0], sizes = [1, 4, 8, 8], strides = [1, 1, 1, 1]} : vector<3x4x8x8xf32> to vector<1x4x8x8xf32>
    %37 = vector.shape_cast %36 : vector<1x4x8x8xf32> to vector<4x8x8xf32>
    %38 = vector.extract_strided_slice %35 {offsets = [1, 0, 0, 0], sizes = [1, 4, 8, 8], strides = [1, 1, 1, 1]} : vector<3x4x8x8xf32> to vector<1x4x8x8xf32>
    %39 = vector.shape_cast %38 : vector<1x4x8x8xf32> to vector<4x8x8xf32>
    %40 = vector.extract_strided_slice %35 {offsets = [2, 0, 0, 0], sizes = [1, 4, 8, 8], strides = [1, 1, 1, 1]} : vector<3x4x8x8xf32> to vector<1x4x8x8xf32>
    %41 = vector.shape_cast %40 : vector<1x4x8x8xf32> to vector<4x8x8xf32>
    %42 = tpu.transpose %37, [0, 2, 1] : vector<4x8x8xf32> -> vector<4x8x8xf32>
    "tpu.trace_start"() <{level = 10 : i32, message = "hqd,hdk->hqk"}> : () -> ()
    %cst_13 = arith.constant dense<0.000000e+00> : vector<4x8x8xf32>
    %43 = tpu.matmul %42, %39, %cst_13 {dimension_numbers = #tpu.dot_dimension_numbers<[2], [1], [1], [2], [0, 0, 0, 1, 1, 2], [0], [0]>} : vector<4x8x8xf32>, vector<4x8x8xf32>, vector<4x8x8xf32> -> vector<4x8x8xf32>
    "tpu.trace_stop"() : () -> ()
    %cst_14 = arith.constant 0.353553385 : f32
    %44 = vector.broadcast %cst_14 : f32 to vector<4x8x8xf32>
    %45 = arith.mulf %43, %44 : vector<4x8x8xf32>
    %46 = tpu.iota {dimensions = array<i32: 0>} : vector<8x8xi32>
    %47 = tpu.iota {dimensions = array<i32: 1>} : vector<8x8xi32>
    %48 = arith.cmpi sle, %47, %46 : vector<8x8xi32>
    %49 = vector.shape_cast %48 : vector<8x8xi1> to vector<1x8x8xi1>
    %cst_15 = arith.constant -1.000000e+30 : f32
    %50 = vector.shape_cast %49 : vector<1x8x8xi1> to vector<1x8x8xi1>
    %51 = vector.broadcast %50 : vector<1x8x8xi1> to vector<4x8x8xi1>
    %52 = vector.broadcast %cst_15 : f32 to vector<4x8x8xf32>
    %53 = arith.select %51, %45, %52 : vector<4x8x8xi1>, vector<4x8x8xf32>
    %cst_16 = arith.constant dense<0xFF800000> : vector<4x8xf32>
    %54 = vector.multi_reduction <maximumf>, %53, %cst_16 [2] : vector<4x8x8xf32> to vector<4x8xf32>
    %55 = vector.shape_cast %54 : vector<4x8xf32> to vector<4x8x1xf32>
    %56 = vector.broadcast %55 : vector<4x8x1xf32> to vector<4x8x8xf32>
    %57 = arith.subf %53, %56 : vector<4x8x8xf32>
    %58 = math.exp %57 : vector<4x8x8xf32>
    %cst_17 = arith.constant dense<0.000000e+00> : vector<4x8xf32>
    %59 = vector.multi_reduction <add>, %58, %cst_17 [2] : vector<4x8x8xf32> to vector<4x8xf32>
    %60 = vector.shape_cast %59 : vector<4x8xf32> to vector<4x8x1xf32>
    %61 = tpu.reciprocal %60 {approx = true} : vector<4x8x1xf32> -> vector<4x8x1xf32>
    %62 = vector.broadcast %61 : vector<4x8x1xf32> to vector<4x8x8xf32>
    %63 = arith.mulf %58, %62 : vector<4x8x8xf32>
    "tpu.trace_start"() <{level = 10 : i32, message = "hdk,hqk->hdq"}> : () -> ()
    %cst_18 = arith.constant dense<0.000000e+00> : vector<4x8x8xf32>
    %64 = tpu.matmul %41, %63, %cst_18 {dimension_numbers = #tpu.dot_dimension_numbers<[2], [2], [1], [1], [0, 0, 0, 1, 1, 1], [0], [0]>} : vector<4x8x8xf32>, vector<4x8x8xf32>, vector<4x8x8xf32> -> vector<4x8x8xf32>
    "tpu.trace_stop"() : () -> ()
    %65 = vector.shape_cast %64 : vector<4x8x8xf32> to vector<32x8xf32>
    %66 = tpu.transpose %65, [1, 0] : vector<32x8xf32> -> vector<8x32xf32>
    %c0_19 = arith.constant 0 : index
    %c0_20 = arith.constant 0 : index
    %67 = vector.load %arg5[%c0_19, %c0_20] : memref<32x32xf32, #tpu.memory_space<vmem>>, vector<32x32xf32>
    %cst_21 = arith.constant dense<0.000000e+00> : vector<8x32xf32>
    %68 = tpu.matmul %66, %67, %cst_21 {dimension_numbers = #tpu.dot_dimension_numbers<[1], [0], [0], [1], [0, 0, 1, 1], [], []>} : vector<8x32xf32>, vector<32x32xf32>, vector<8x32xf32> -> vector<8x32xf32>
    %69 = vector.broadcast %7 : vector<1x32xf32> to vector<8x32xf32>
    %70 = arith.addf %68, %69 : vector<8x32xf32>
    %71 = arith.addf %1, %70 : vector<8x32xf32>
    %cst_22 = arith.constant dense<0.000000e+00> : vector<8xf32>
    %72 = vector.multi_reduction <add>, %71, %cst_22 [1] : vector<8x32xf32> to vector<8xf32>
    %73 = vector.shape_cast %72 : vector<8xf32> to vector<8x1xf32>
    %cst_23 = arith.constant 3.200000e+01 : f32
    %74 = vector.broadcast %cst_23 : f32 to vector<8x1xf32>
    %75 = arith.divf %73, %74 : vector<8x1xf32>
    %76 = vector.broadcast %75 : vector<8x1xf32> to vector<8x32xf32>
    %77 = arith.subf %71, %76 : vector<8x32xf32>
    %78 = arith.mulf %77, %77 : vector<8x32xf32>
    %cst_24 = arith.constant dense<0.000000e+00> : vector<8xf32>
    %79 = vector.multi_reduction <add>, %78, %cst_24 [1] : vector<8x32xf32> to vector<8xf32>
    %80 = vector.shape_cast %79 : vector<8xf32> to vector<8x1xf32>
    %cst_25 = arith.constant 3.200000e+01 : f32
    %81 = vector.broadcast %cst_25 : f32 to vector<8x1xf32>
    %82 = arith.divf %80, %81 : vector<8x1xf32>
    %cst_26 = arith.constant 9.99999974E-6 : f32
    %83 = vector.broadcast %cst_26 : f32 to vector<8x1xf32>
    %84 = arith.addf %82, %83 : vector<8x1xf32>
    %85 = math.rsqrt %84 : vector<8x1xf32>
    %86 = vector.broadcast %85 : vector<8x1xf32> to vector<8x32xf32>
    %87 = arith.mulf %77, %86 : vector<8x32xf32>
    %88 = vector.broadcast %5 : vector<1x32xf32> to vector<8x32xf32>
    %89 = arith.mulf %87, %88 : vector<8x32xf32>
    %90 = vector.broadcast %6 : vector<1x32xf32> to vector<8x32xf32>
    %91 = arith.addf %89, %90 : vector<8x32xf32>
    %c0_27 = arith.constant 0 : index
    %c0_28 = arith.constant 0 : index
    %92 = vector.load %arg6[%c0_27, %c0_28] : memref<32x128xf32, #tpu.memory_space<vmem>>, vector<32x128xf32>
    %cst_29 = arith.constant dense<0.000000e+00> : vector<8x128xf32>
    %93 = tpu.matmul %91, %92, %cst_29 {dimension_numbers = #tpu.dot_dimension_numbers<[1], [0], [0], [1], [0, 0, 1, 1], [], []>} : vector<8x32xf32>, vector<32x128xf32>, vector<8x128xf32> -> vector<8x128xf32>
    %c0_30 = arith.constant 0 : index
    %c0_31 = arith.constant 0 : index
    %94 = vector.load %arg7[%c0_30, %c0_31] : memref<1x128xf32, #tpu.memory_space<vmem>>, vector<1x128xf32>
    %95 = vector.broadcast %94 : vector<1x128xf32> to vector<8x128xf32>
    %96 = arith.addf %93, %95 : vector<8x128xf32>
    %cst_32 = arith.constant 5.000000e-01 : f32
    %97 = vector.broadcast %cst_32 : f32 to vector<8x128xf32>
    %98 = arith.mulf %97, %96 : vector<8x128xf32>
    %cst_33 = arith.constant 4.471500e-02 : f32
    %99 = vector.broadcast %cst_33 : f32 to vector<8x128xf32>
    %100 = arith.mulf %99, %96 : vector<8x128xf32>
    %101 = arith.mulf %100, %96 : vector<8x128xf32>
    %102 = arith.mulf %101, %96 : vector<8x128xf32>
    %103 = arith.addf %96, %102 : vector<8x128xf32>
    %cst_34 = arith.constant 0.797884583 : f32
    %104 = vector.broadcast %cst_34 : f32 to vector<8x128xf32>
    %105 = arith.mulf %104, %103 : vector<8x128xf32>
    %106 = math.tanh %105 : vector<8x128xf32>
    %cst_35 = arith.constant 1.000000e+00 : f32
    %107 = vector.broadcast %cst_35 : f32 to vector<8x128xf32>
    %108 = arith.addf %107, %106 : vector<8x128xf32>
    %109 = arith.mulf %98, %108 : vector<8x128xf32>
    %c0_36 = arith.constant 0 : index
    %c0_37 = arith.constant 0 : index
    %110 = vector.load %arg8[%c0_36, %c0_37] : memref<128x32xf32, #tpu.memory_space<vmem>>, vector<128x32xf32>
    %cst_38 = arith.constant dense<0.000000e+00> : vector<8x32xf32>
    %111 = tpu.matmul %109, %110, %cst_38 {dimension_numbers = #tpu.dot_dimension_numbers<[1], [0], [0], [1], [0, 0, 1, 1], [], []>} : vector<8x128xf32>, vector<128x32xf32>, vector<8x32xf32> -> vector<8x32xf32>
    %112 = vector.broadcast %8 : vector<1x32xf32> to vector<8x32xf32>
    %113 = arith.addf %111, %112 : vector<8x32xf32>
    %114 = arith.addf %71, %113 : vector<8x32xf32>
    %c0_39 = arith.constant 0 : index
    %c0_40 = arith.constant 0 : index
    %c0_41 = arith.constant 0 : index
    %115 = vector.load %arg9[%c0_39, %c0_40, %c0_41] : memref<1x8x32xf32, #tpu.memory_space<vmem>>, vector<1x8x32xf32>
    %116 = vector.shape_cast %115 : vector<1x8x32xf32> to vector<8x32xf32>
    %117 = vector.shape_cast %114 : vector<8x32xf32> to vector<1x8x32xf32>
    tpu.vector_store %arg9[%c0_39, %c0_40, %c0_41], %117 {strides = array<i32>} : memref<1x8x32xf32, #tpu.memory_space<vmem>>, vector<1x8x32xf32>,
    return
  }
  func.func @transform_0(%arg0: i32) -> (i32, i32, i32) {
    %c0_i32 = arith.constant 0 : i32
    %c0_i32_0 = arith.constant 0 : i32
    %c0_i32_1 = arith.constant 0 : i32
    return %arg0, %c0_i32, %c0_i32_0 : i32, i32, i32
  }
  func.func @transform_1(%arg0: i32) -> (i32, i32) {
    %c0_i32 = arith.constant 0 : i32
    %c0_i32_0 = arith.constant 0 : i32
    %c0_i32_1 = arith.constant 0 : i32
    return %c0_i32, %c0_i32_0 : i32, i32
  }
  func.func @transform_2(%arg0: i32) -> (i32, i32) {
    %c0_i32 = arith.constant 0 : i32
    %c0_i32_0 = arith.constant 0 : i32
    %c0_i32_1 = arith.constant 0 : i32
    return %c0_i32, %c0_i32_0 : i32, i32
  }
  func.func @transform_3(%arg0: i32) -> (i32, i32) {
    %c0_i32 = arith.constant 0 : i32
    %c0_i32_0 = arith.constant 0 : i32
    %c0_i32_1 = arith.constant 0 : i32
    return %c0_i32, %c0_i32_0 : i32, i32
  }
  func.func @transform_4(%arg0: i32) -> (i32, i32) {
    %c0_i32 = arith.constant 0 : i32
    %c0_i32_0 = arith.constant 0 : i32
    %c0_i32_1 = arith.constant 0 : i32
    return %c0_i32, %c0_i32_0 : i32, i32
  }
  func.func @transform_5(%arg0: i32) -> (i32, i32) {
    %c0_i32 = arith.constant 0 : i32
    %c0_i32_0 = arith.constant 0 : i32
    %c0_i32_1 = arith.constant 0 : i32
    return %c0_i32, %c0_i32_0 : i32, i32
  }
  func.func @transform_6(%arg0: i32) -> (i32, i32) {
    %c0_i32 = arith.constant 0 : i32
    %c0_i32_0 = arith.constant 0 : i32
    %c0_i32_1 = arith.constant 0 : i32
    return %c0_i32, %c0_i32_0 : i32, i32
  }
  func.func @transform_7(%arg0: i32) -> (i32, i32) {
    %c0_i32 = arith.constant 0 : i32
    %c0_i32_0 = arith.constant 0 : i32
    %c0_i32_1 = arith.constant 0 : i32
    return %c0_i32, %c0_i32_0 : i32, i32
  }
  func.func @transform_8(%arg0: i32) -> (i32, i32, i32) {
    %c0_i32 = arith.constant 0 : i32
    %c0_i32_0 = arith.constant 0 : i32
    %c0_i32_1 = arith.constant 0 : i32
    return %arg0, %c0_i32, %c0_i32_0 : i32, i32, i32
  }
}

</mosaic_0001>

<bundles_post_ra>
// kernel: tpu_custom_call.1
= control target key start
LH: loop header
LB: loop body
LE: loop exit
PB: predicated region body
PF: predicated region fallthrough
CT: control target
= control target key end

     0   :  { %13 = vsyncpa [#allocation3], 0  ;;  %s2339_s0 = inlined_call_operand.vmem [shape: f32[2,8,32], index: 0, kind: input, shape index: {}]   ;;  %s2340_s1 = inlined_call_operand.vmem [shape: f32[6,32], index: 1, kind: input, shape index: {}]   ;;  %s2341_s2 = inlined_call_operand.vmem [shape: f32[32,96], index: 2, kind: input, shape index: {}]   ;;  %s2342_s3 = inlined_call_operand.vmem [shape: f32[1,96], index: 3, kind: input, shape index: {}]   ;;  %s2343_s4 = inlined_call_operand.vmem [shape: f32[32,32], index: 4, kind: input, shape index: {}]   ;;  %s2344_s5 = inlined_call_operand.vmem [shape: f32[32,128], index: 5, kind: input, shape index: {}]   ;;  %s2345_s6 = inlined_call_operand.vmem [shape: f32[1,128], index: 6, kind: input, shape index: {}]   ;;  %s2346_s7 = inlined_call_operand.vmem [shape: f32[128,32], index: 7, kind: input, shape index: {}]   ;;  %s2347_s8 = inlined_call_operand.hbm [shape: f32[2,8,32], index: 8, kind: output, shape index: {}]  }
   0x1   :  { %15 = vsyncpa [#allocation3 + $0x1], 0  ;;  %s2025_s27 = smov 0   ;;  %s2027_s28 = smov 0  }
   0x2   :  { %s2029_s29 = smov 0   ;;  %s2031_s30 = smov 0  }
   0x3 LB: > { %s2046_s9 = sadd.s32 4294967295, %s1974_s30   ;;  %s1623_s10 = sadd.s32 4294967294, %s1974_s30   ;;  %s1974_s30 = sphi %s2031_s30, %s2353_s30   ;;  %s1970_s29 = sphi %s2029_s29, %s2352_s29   ;;  %s1966_s28 = sphi %s2027_s28, %s2351_s28   ;;  %s1962_s27 = sphi %s2025_s27, %s2350_s27  }
   0x4   : > { %s2050_s11 = sadd.s32 1, %s1974_s30   ;;  %s201_s12 = sadd.s32 1, %s1970_s29 }
   0x5   : > { %s198_s13 = ssub.s32 %s1974_s30, %s2050_s11  ;;  %p211_p0 = scmp.ne.s32.totalorder %s1970_s29, %s1966_s28 }
   0x6   : > { %p199_p1 = scmp.eq.s32.totalorder %s198_s13, 0  ;;  %p212_p2 = scmp.eq.s32.totalorder %s2046_s9, 1 }
   0x7   : > { %p217_p3 = scmp.ne.s32.totalorder %s1966_s28, %s1962_s27  ;;  %p218_p4 = scmp.eq.s32.totalorder %s1623_s10, 1 }
   0x8   : > { %s2061_s14 = scalar_select %p199_p1, %s1970_s29, %s201_s12  }
   0x9   : > { %p2063_p5 = por %p212_p2, %p211_p0  ;;  %p2067_p6 = por %p218_p4, %p217_p3 }
   0xa   : > { %p1626_p7 = scmp.ge.s32.totalorder %s1974_s30, 1  ;;  %p264_p8 = scmp.lt.s32.totalorder %s1974_s30, 3 }
   0xc   : > { %p265_p9 = pnand %p1626_p7, %p264_p8 }
   0xd   : > { %p297_p10 = scmp.lt.s32.totalorder (!%p265_p9), %s2046_s9, 1  ;;  %vm303_vm0 = vcmask (!%p265_p9), 261120   ;;  %v328_v7 = vld [vmem:[%s2341_s2] sm:$0xff] (!%p265_p9)  ;;  %v329_v8 = vld [vmem:[%s2341_s2 + $0x8] sm:$0xff] (!%p265_p9)  ;;  %v330_v9 = vld [vmem:[%s2341_s2 + $0x10] sm:$0xff] (!%p265_p9)  ;;  %v1976_v10 = vmov (!%p265_p9), 0.0|0.0   ;;  %v318_v17 = vlaneseq (!%p265_p9) }
   0xe   : > { %268 = sbr.rel (%p265_p9) target bundleno = 2682 (0xa7a), region = 52  ;;  %1806 = vmatprep.subr.bf16.mxu0 (!%p265_p9), %v1976_v10  ;;  %v1807_v11 = vpack.c.bf16 (!%p265_p9), %v329_v8, %v328_v7  ;;  %v331_v12 = vld [vmem:[%s2341_s2 + $0x18] sm:$0xff] (!%p265_p9)  ;;  %vm1977_vm1 = vmmov (!%p265_p9), 0   ;;  %v1978_v13 = vmov (!%p265_p9), 0.0   ;;  %v2110_v21 = vld [vmem:[%s2340_s1] sm:$0x3f] (!%p265_p9) }
   0xf   : > { %1706 = vmatprep.mubr.msk.f32.mxu0 (!%p265_p9), %vm1977_vm1, %v1978_v13  ;;  %1719 = vmatprep.subr.mxu1 (!%p265_p9), %v1978_v13  ;;  %v1810_v14 = vpack.c.bf16 (!%p265_p9), %v331_v12, %v330_v9  ;;  %v2104_v19 = vshrl.u32 (!%p265_p9), %v318_v17, 7  ;;  %v1629_v29 = vld [vmem:[%s2342_s3] ss:$0 sm:$0xff] (!%p265_p9)  ;;  %vm572_vm2 = vcmask (!%p265_p9), 64512   ;;  %v872_v49 = vand.u32 (!%p265_p9), 127, %v318_v17  ;;  %s294_s19 = sand.u32 (!%p265_p9), 1, %s1966_s28  }
  0x10   : > { %1721 = vmatprep.mubr.msk.f32.mxu1 (!%p265_p9), %vm1977_vm1, %v1978_v13  ;;  %1808 = vmatpush3.bf16.msra.mxu0 (!%p265_p9), %v1807_v11  ;;  %s1627_s20 = sshll.u32 (!%p265_p9), %s294_s19, 3  ;;  %s1551_s10 = scalar_lea.sflag (!%p265_p9), [#allocation3], %s294_s19 }
  0x11   : > { %1809 = vmatprep.subr.bf16.mxu0 (!%p265_p9), %v1976_v10  ;;  %v320_v20 = vsub.s32 (!%p265_p9), 0, %v2104_v19  ;;  %v325_v22 = vsub.s32 (!%p265_p9), 1, %v2104_v19  ;;  %vm873_vm3 = vcmp.le.s32.totalorder (!%p265_p9), %v872_v49, %v2104_v19  ;;  %s296_s22 = scalar_lea.vmem (!%p265_p9), [#allocation2], %s1627_s20  ;;  %s1979_s12 = smov (!%p265_p9), [#allocation2]  }
  0x12   : > { %s1564_s23 = sshll.u32 (!%p265_p9), %s296_s22, 4  ;;  %s1916_s13 = sshll.u32 (!%p265_p9), %s1979_s12, 4  ;;  %s2298_s23 = int_to_ptr.vmem [resolvable:$true] %s1564_s23  ;;  %s1917_s13 = int_to_ptr.vmem [resolvable:$false] %s1916_s13 }
  0x13   : > { %v321_v23 = vrot.slane (!%p265_p9), %v2110_v21, %v320_v20  ;;  %v326_v26 = vrot.slane (!%p265_p9), %v2110_v21, %v325_v22  ;;  %p1919_p0 = scmp.lt.s32.totalorder (!%p265_p9), %s2298_s23, %s1917_s13 }
  0x14   : > { %1811 = vmatpush3.bf16.msra.mxu0 (!%p265_p9), %v1810_v14 }
  0x15   : > { %s298_s17 = scalar_select %p297_p10, %s2046_s9, 1  ;;  %1709 = vmatprep.subr.mxu0 %v1978_v13 }
  0x17   : > { %s1628_s18 = sshll.u32 %s298_s17, 3  ;;  %s1918_s17 = scalar_lea.vmem %s1917_s13, 256 }
  0x18   : > { %s300_s21 = scalar_lea.vmem %s2339_s0, %s1628_s18 }
  0x19   : > { %v2078_v0 = vld [vmem:[%s300_s21] sm:$0xff]  ;;  %s1647_s21 = sshll.u32 %s2046_s9, 7  ;;  %s1912_s9 = scalar_lea.vmem %s2298_s23, 128 }
  0x1a   : > { %v304_v1 = vsel %vm303_vm0, %v2078_v0, 0.0  ;;  %s2296_s26 = scalar_lea.hbm %s2347_s8, %s1647_s21  ;;  %p1913_p11 = scmp.ne.s32.totalorder %s2298_s23, %s1912_s9 }
  0x1b   : > { %305 = vadd.xlane.f32.xlu0 %v304_v1  ;;  %p1920_p1 = scmp.lt.s32.totalorder %s1918_s17, %s1912_s9 }
  0x1c   : > { %p1914_p12 = pnand %p1913_p11, %p2063_p5 }
  0x1d   : > { %p1921_p2 = por %p1920_p1, %p1919_p0 }
  0x1e   : > { %p1915_p13 = pneg %p1914_p12 }
  0x20   : > { %p1922_p3 = pnand %p1921_p2, %p1915_p13 }
  0xa8   : > { %v306_v2 = vpop.xlane.xlu0 %305 }
  0xa9   : > { %v308_v3 = vmul.f32 0.03125, %v306_v2 }
  0xab   : > { %v309_v4 = vsub.f32 %v2078_v0, %v308_v3 }
  0xad   : > { %v310_v5 = vmul.f32 %v309_v4, %v309_v4 }
  0xaf   : > { %v311_v6 = vsel %vm303_vm0, %v310_v5, 0.0 }
  0xb0   : > { %312 = vadd.xlane.f32.xlu0 %v311_v6 }
 0x13d   : > { %v313_v15 = vpop.xlane.xlu0 %312 }
 0x13e   : > { %v314_v16 = vmul.f32 0.03125, %v313_v15 }
 0x140   : > { %v315_v18 = vadd.f32 1e-05, %v314_v16 }
 0x142   : > { %1890 = vrsqrt.f32 %v315_v18 }
 0x14c   : > { %v1891_v24 = vpop.eup %1890 }
 0x14d   : > { %v317_v25 = vmul.f32 %v1891_v24, %v309_v4 }
 0x14f   : > { %v322_v27 = vmul.f32 %v321_v23, %v317_v25 }
 0x151   : > { %v327_v28 = vadd.f32 %v326_v26, %v322_v27 }
 0x153   : > { %1707 = vmatmul.mubr.msk.f32.vlgmr.msra.gmra.mrb[0].mxu0 %vm303_vm0, %v327_v28 }
 0x154   : > { %1711 = vmatprep.mubr.msk.f32.mxu0 %vm1977_vm1, %v1978_v13 }
 0x226   : > { %v408_v30 = vpop.f32.mrb[0].mxu0 }
 0x227   : > { %v1708_v31 = vpop.f32.mrb[1].mxu0  ;;  %v409_v32 = vadd.f32 %v1629_v29, %v408_v30 }
 0x229   : > { %412 = vxpose.xlu1.b32.start.end [1/1] (short) (narrow) %v409_v32, 96 }
 0x2a9   : > { %v428_v33 = vpop.trf.xlu1 }
 0x2aa   : > { %444 = vxpose.xlu1.b32.start.end [1/1] (short) (narrow) %v428_v33, 8 }
 0x2ad   : > { %v429_v34 = vpop.trf.xlu1 }
 0x2ae   : > { %476 = vxpose.xlu0.b32.start.end [1/1] (short) (narrow) %v429_v34, 8 }
 0x2b1   : > { %v430_v35 = vpop.trf.xlu1 }
 0x2b2   : > { %508 = vxpose.xlu1.b32.start.end [1/1] (short) (narrow) %v430_v35, 8 }
 0x2b5   : > { %v431_v36 = vpop.trf.xlu1 }
 0x2b6   : > { %540 = vxpose.xlu0.b32.start.end [1/1] (short) (narrow) %v431_v36, 8 }
 0x2b9   : > { %v432_v37 = vpop.trf.xlu1 }
 0x2ba   : > { %1710 = vmatpush3.msra.mxu0 %v432_v37 }
 0x2bb   : > { %1714 = vmatprep.subr.mxu0 %v1978_v13 }
 0x2bd   : > { %v433_v38 = vpop.trf.xlu1 }
 0x2c1   : > { %v434_v39 = vpop.trf.xlu1 }
 0x2c2   : > { %1720 = vmatpush3.msra.mxu1 %v434_v39 }
 0x2c3   : > { %1729 = vmatprep.subr.mxu1 %v1978_v13 }
 0x2c5   : > { %v435_v40 = vpop.trf.xlu1 }
 0x2c9   : > { %v2123_v41 = vpop.trf.xlu1 }
 0x2cd   : > { %v2125_v42 = vpop.trf.xlu1 }
 0x2d1   : > { %v2127_v43 = vpop.trf.xlu1 }
 0x2d5   : > { %v2129_v44 = vpop.trf.xlu1 }
 0x32a   : > { %v460_v45 = vpop.trf.xlu1 }
 0x32b   : > { %1712 = vmatmul.mubr.msk.f32.vlgmr.msra.gmra.mrb[2].mxu0 %vm572_vm2, %v460_v45 }
 0x32c   : > { %1715 = vmatpush3.msra.mxu0 %v433_v38  ;;  %1716 = vmatprep.mubr.msk.f32.mxu0 %vm1977_vm1, %v1978_v13 }
 0x32d   : > { %1724 = vmatprep.subr.mxu0 %v1978_v13 }
 0x32e   : > { %v492_v46 = vpop.trf.xlu0 }
 0x32f   : > { %1717 = vmatmul.mubr.msk.f32.vlgmr.msra.gmra.mrb[4].mxu0 %vm572_vm2, %v492_v46  ;;  %v1262_v46 = vld [vmem:[%s2343_s4 + $0x10] sm:$0xff] }
 0x330   : > { %1725 = vmatpush3.msra.mxu0 %v435_v40  ;;  %1726 = vmatprep.mubr.msk.f32.mxu0 %vm1977_vm1, %v1978_v13 }
 0x331   : > { %1734 = vmatprep.subr.mxu0 %v1978_v13 }
 0x332   : > { %v524_v47 = vpop.trf.xlu1 }
 0x333   : > { %1722 = vmatmul.mubr.msk.f32.vlgmr.msra.gmra.mrb[0].mxu1 %vm572_vm2, %v524_v47 }
 0x334   : > { %1731 = vmatprep.mubr.msk.f32.mxu1 %vm1977_vm1, %v1978_v13 }
 0x336   : > { %v556_v48 = vpop.trf.xlu0 }
 0x337   : > { %1727 = vmatmul.mubr.msk.f32.vlgmr.msra.gmra.mrb[6].mxu0 %vm572_vm2, %v556_v48 }
 0x338   : > { %1736 = vmatprep.mubr.msk.f32.mxu0 %vm1977_vm1, %v1978_v13 }
 0x3fe   : > { %v642_v50 = vpop.f32.mrb[2].mxu0 }
 0x3ff   : > { %v865_v51 = vmul.f32 0.35355338, %v642_v50  ;;  %v1713_v52 = vpop.f32.mrb[3].mxu0 }
 0x401   : > { %v876_v53 = vsel %vm873_vm3, %v865_v51, -1e+30 }
 0x402   : > { %v715_v54 = vpop.f32.mrb[4].mxu0  ;;  %v880_v55 = vsel %vm572_vm2, %v876_v53, -inf }
 0x403   : > { %v866_v56 = vmul.f32 0.35355338, %v715_v54  ;;  %881 = vmax.xlane.f32.xlu1 %v880_v55  ;;  %v1718_v57 = vpop.f32.mrb[5].mxu0 }
 0x405   : > { %v877_v58 = vsel %vm873_vm3, %v866_v56, -1e+30 }
 0x406   : > { %v788_v59 = vpop.f32.mrb[0].mxu1  ;;  %v883_v60 = vsel %vm572_vm2, %v877_v58, -inf }
 0x407   : > { %v867_v61 = vmul.f32 0.35355338, %v788_v59  ;;  %v1723_v62 = vpop.f32.mrb[1].mxu1  ;;  %884 = vmax.xlane.f32.xlu0 %v883_v60 }
 0x409   : > { %v878_v63 = vsel %vm873_vm3, %v867_v61, -1e+30 }
 0x40a   : > { %v861_v1 = vpop.f32.mrb[6].mxu0  ;;  %v886_v2 = vsel %vm572_vm2, %v878_v63, -inf }
 0x40b   : > { %v868_v3 = vmul.f32 0.35355338, %v861_v1  ;;  %887 = vmax.xlane.f32.xlu1 %v886_v2  ;;  %v1728_v4 = vpop.f32.mrb[7].mxu0 }
 0x40d   : > { %v879_v5 = vsel %vm873_vm3, %v868_v3, -1e+30 }
 0x40e   : > { %v889_v6 = vsel %vm572_vm2, %v879_v5, -inf }
 0x40f   : > { %890 = vmax.xlane.f32.xlu1 %v889_v6  ;;  %v1365_v6 = vld [vmem:[%s2344_s5] sm:$0xff] }
 0x490   : > { %v882_v7 = vpop.xlane.xlu1 %881 }
 0x491   : > { %v892_v8 = vsub.f32 %v876_v53, %v882_v7 }
 0x493   : > { %v896_v9 = vmul.f32 1.442695, %v892_v8  ;;  %v1367_v8 = vld [vmem:[%s2344_s5 + $0x10] sm:$0xff] }
 0x494   : > { %v885_v11 = vpop.xlane.xlu0 %884 }
 0x495   : > { %1892 = vpow2.f32 %v896_v9  ;;  %v893_v12 = vsub.f32 %v877_v58, %v885_v11  ;;  %v1266_v58 = vsub.s32 4, %v2104_v19  ;;  %v1368_v9 = vld [vmem:[%s2344_s5 + $0x18] sm:$0xff] }
 0x496   : > { %v1822_v11 = vpack.c.bf16 %v1368_v9, %v1367_v8 }
 0x497   : > { %v898_v14 = vmul.f32 1.442695, %v893_v12  ;;  %v1267_v59 = vrot.slane %v2110_v21, %v1266_v58  ;;  %v1458_v12 = vld [vmem:[%s2346_s7] sm:$0xff] }
 0x498   : > { %v888_v15 = vpop.xlane.xlu1 %887 }
 0x499   : > { %1894 = vpow2.f32 %v898_v14  ;;  %v894_v16 = vsub.f32 %v878_v63, %v888_v15  ;;  %v1459_v14 = vld [vmem:[%s2346_s7 + $0x8] sm:$0xff] }
 0x49a   : > { %v1825_v15 = vpack.c.bf16 %v1459_v14, %v1458_v12 }
 0x49b   : > { %v900_v17 = vmul.f32 1.442695, %v894_v16 }
 0x49c   : > { %v891_v18 = vpop.xlane.xlu1 %890 }
 0x49d   : > { %1896 = vpow2.f32 %v900_v17  ;;  %v895_v20 = vsub.f32 %v879_v5, %v891_v18 }
 0x49f   : > { %v1893_v22 = vpop.eup %1892  ;;  %v902_v23 = vmul.f32 1.442695, %v895_v20  ;;  %v1357_v20 = vsub.s32 2, %v2104_v19 }
 0x4a0   : > { %v904_v24 = vsel %vm572_vm2, %v1893_v22, 0.0 }
 0x4a1   : > { %1898 = vpow2.f32 %v902_v23  ;;  %905 = vadd.xlane.f32.xlu1 %v904_v24  ;;  %v1358_v23 = vrot.slane %v2110_v21, %v1357_v20 }
 0x4a3   : > { %v1895_v25 = vpop.eup %1894 }
 0x4a4   : > { %v907_v26 = vsel %vm572_vm2, %v1895_v25, 0.0 }
 0x4a5   : > { %908 = vadd.xlane.f32.xlu0 %v907_v26 }
 0x4a7   : > { %v1897_v27 = vpop.eup %1896 }
 0x4a8   : > { %v910_v28 = vsel %vm572_vm2, %v1897_v27, 0.0 }
 0x4a9   : > { %911 = vadd.xlane.f32.xlu1 %v910_v28 }
 0x4ab   : > { %v1899_v29 = vpop.eup %1898 }
 0x4ac   : > { %v913_v30 = vsel %vm572_vm2, %v1899_v29, 0.0 }
 0x4ad   : > { %914 = vadd.xlane.f32.xlu0 %v913_v30  ;;  %v1461_v30 = vld [vmem:[%s2346_s7 + $0x18] sm:$0xff] }
 0x52e   : > { %v906_v31 = vpop.xlane.xlu1 %905 }
 0x52f   : > { %1900 = vrcp.f32 %v906_v31 }
 0x532   : > { %v909_v32 = vpop.xlane.xlu0 %908 }
 0x533   : > { %1902 = vrcp.f32 %v909_v32  ;;  %v1462_v32 = vld [vmem:[%s2346_s7 + $0x20] sm:$0xff] }
 0x536   : > { %v912_v33 = vpop.xlane.xlu1 %911 }
 0x537   : > { %1904 = vrcp.f32 %v912_v33  ;;  %v1463_v33 = vld [vmem:[%s2346_s7 + $0x28] sm:$0xff] }
 0x539   : > { %v1901_v34 = vpop.eup %1900 }
 0x53a   : > { %v920_v35 = vmul.f32 %v1901_v34, %v1893_v22  ;;  %v915_v36 = vpop.xlane.xlu0 %914  ;;  %v1362_v22 = vsub.s32 3, %v2104_v19  ;;  %v1831_v34 = vpack.c.bf16 %v1463_v33, %v1462_v32 }
 0x53b   : > { %1906 = vrcp.f32 %v915_v36  ;;  %v1465_v36 = vld [vmem:[%s2346_s7 + $0x38] sm:$0xff] }
 0x53c   : > { %1730 = vmatpush3.xpose.msk.msra.mxu1 %vm572_vm2, %v920_v35  ;;  %v1363_v26 = vrot.slane %v2110_v21, %v1362_v22  ;;  %v1464_v35 = vld [vmem:[%s2346_s7 + $0x30] sm:$0xff] }
 0x53d   : > { %v1903_v37 = vpop.eup %1902  ;;  %1739 = vmatprep.subr.mxu1 %v1978_v13 }
 0x53e   : > { %v921_v38 = vmul.f32 %v1903_v37, %v1895_v25  ;;  %v1834_v37 = vpack.c.bf16 %v1465_v36, %v1464_v35 }
 0x53f   : > { %1732 = vmatmul.mubr.msk.f32.vlgmr.msra.gmra.mrb[2].mxu1 %vm572_vm2, %v2123_v41 }
 0x540   : > { %1735 = vmatpush3.xpose.msk.msra.mxu0 %vm572_vm2, %v921_v38  ;;  %1741 = vmatprep.mubr.msk.f32.mxu1 %vm1977_vm1, %v1978_v13  ;;  %v1466_v38 = vld [vmem:[%s2346_s7 + $0x40] sm:$0xff] }
 0x541   : > { %v1905_v39 = vpop.eup %1904  ;;  %1744 = vmatprep.subr.mxu0 %v1978_v13 }
 0x542   : > { %v922_v40 = vmul.f32 %v1905_v39, %v1897_v27  ;;  %v1467_v39 = vld [vmem:[%s2346_s7 + $0x48] sm:$0xff] }
 0x543   : > { %1737 = vmatmul.mubr.msk.f32.vlgmr.msra.gmra.mrb[8].mxu0 %vm572_vm2, %v2125_v42  ;;  %v1260_v42 = vld [vmem:[%s2343_s4] sm:$0xff] }
 0x544   : > { %1740 = vmatpush3.xpose.msk.msra.mxu1 %vm572_vm2, %v922_v40  ;;  %1746 = vmatprep.mubr.msk.f32.mxu0 %vm1977_vm1, %v1978_v13  ;;  %v1837_v40 = vpack.c.bf16 %v1467_v39, %v1466_v38 }
 0x545   : > { %v1907_v45 = vpop.eup %1906  ;;  %1824 = vmatprep.subr.bf16.mxu1 %v1976_v10 }
 0x546   : > { %v923_v41 = vmul.f32 %v1907_v45, %v1899_v29  ;;  %v1460_v29 = vld [vmem:[%s2346_s7 + $0x10] sm:$0xff] }
 0x547   : > { %1742 = vmatmul.mubr.msk.f32.vlgmr.msra.gmra.mrb[4].mxu1 %vm572_vm2, %v2127_v43  ;;  %v1261_v43 = vld [vmem:[%s2343_s4 + $0x8] sm:$0xff]  ;;  %v1828_v31 = vpack.c.bf16 %v1461_v30, %v1460_v29  ;;  %v1468_v45 = vld [vmem:[%s2346_s7 + $0x50] sm:$0xff] }
 0x548   : > { %1745 = vmatpush3.xpose.msk.msra.mxu0 %vm572_vm2, %v923_v41  ;;  %1803 = vmatprep.mubr.msk.f32.mxu1 %vm1977_vm1, %v1978_v13  ;;  %v1813_v47 = vpack.c.bf16 %v1261_v43, %v1260_v42  ;;  %v1469_v41 = vld [vmem:[%s2346_s7 + $0x58] sm:$0xff]  ;;  %v1470_v43 = vld [vmem:[%s2346_s7 + $0x60] sm:$0xff] }
 0x549   : > { %1812 = vmatprep.subr.bf16.mxu0 %v1976_v10  ;;  %1826 = vmatpush3.bf16.msra.mxu1 %v1825_v15  ;;  %v1840_v42 = vpack.c.bf16 %v1469_v41, %v1468_v45 }
 0x54a   : > { %1827 = vmatprep.subr.bf16.mxu1 %v1976_v10 }
 0x54b   : > { %1747 = vmatmul.mubr.msk.f32.vlgmr.msra.gmra.mrb[10].mxu0 %vm572_vm2, %v2129_v44  ;;  %v1263_v44 = vld [vmem:[%s2343_s4 + $0x18] sm:$0xff] }
 0x54c   : > { %1757 = vmatprep.mubr.msk.f32.mxu0 %vm1977_vm1, %v1978_v13  ;;  %1814 = vmatpush3.bf16.msra.mxu0 %v1813_v47  ;;  %v1816_v48 = vpack.c.bf16 %v1263_v44, %v1262_v46  ;;  %v1471_v46 = vld [vmem:[%s2346_s7 + $0x68] sm:$0xff]  ;;  %v1472_v44 = vld [vmem:[%s2346_s7 + $0x70] sm:$0xff] }
 0x54d   : > { %1815 = vmatprep.subr.bf16.mxu0 %v1976_v10  ;;  %1829 = vmatpush3.bf16.msra.mxu1 %v1828_v31  ;;  %v1843_v47 = vpack.c.bf16 %v1471_v46, %v1470_v43 }
 0x54e   : > { %1830 = vmatprep.subr.bf16.mxu1 %v1976_v10 }
 0x550   : > { %1817 = vmatpush3.bf16.msra.mxu0 %v1816_v48  ;;  %v1473_v48 = vld [vmem:[%s2346_s7 + $0x78] sm:$0xff] }
 0x551   : > { %1818 = vmatprep.subr.bf16.mxu0 %v1976_v10  ;;  %1832 = vmatpush3.bf16.msra.mxu1 %v1831_v34 }
 0x552   : > { %1833 = vmatprep.subr.bf16.mxu1 %v1976_v10 }
 0x555   : > { %1835 = vmatpush3.bf16.msra.mxu1 %v1834_v37 }
 0x556   : > { %1836 = vmatprep.subr.bf16.mxu1 %v1976_v10 }
 0x559   : > { %1838 = vmatpush3.bf16.msra.mxu1 %v1837_v40 }
 0x55a   : > { %1839 = vmatprep.subr.bf16.mxu1 %v1976_v10 }
 0x55d   : > { %1841 = vmatpush3.bf16.msra.mxu1 %v1840_v42 }
 0x55e   : > { %1842 = vmatprep.subr.bf16.mxu1 %v1976_v10 }
 0x561   : > { %1844 = vmatpush3.bf16.msra.mxu1 %v1843_v47 }
 0x562   : > { %1845 = vmatprep.subr.bf16.mxu1 %v1976_v10 }
 0x612   : > { %v996_v49 = vpop.f32.mrb[2].mxu1 }
 0x613   : > { %1228 = vxpose.xlu1.b32.start [1/4] (short) (narrow) %v996_v49, 8  ;;  %v1733_v50 = vpop.f32.mrb[3].mxu1  ;;  %v1846_v49 = vpack.c.bf16 %v1473_v48, %v1472_v44 }
 0x614   : > { %v1644_v50 = vld [vmem:[%s2345_s6] ss:$0 sm:$0xff] }
 0x615   : > { %1847 = vmatpush3.bf16.msra.mxu1 %v1846_v49 }
 0x616   : > { %v1072_v51 = vpop.f32.mrb[8].mxu0 }
 0x617   : > { %1229 = vxpose.xlu1.b32.cont [2/4] (short) (narrow) %v1072_v51, 8  ;;  %v1738_v52 = vpop.f32.mrb[9].mxu0 }
 0x61a   : > { %v1148_v53 = vpop.f32.mrb[4].mxu1 }
 0x61b   : > { %v1743_v54 = vpop.f32.mrb[5].mxu1  ;;  %1230 = vxpose.xlu1.b32.cont [3/4] (short) (narrow) %v1148_v53, 8 }
 0x61e   : > { %v1224_v55 = vpop.f32.mrb[10].mxu0 }
 0x61f   : > { %1231 = vxpose.xlu1.b32.end [4/4] (short) (narrow) %v1224_v55, 8  ;;  %v1748_v56 = vpop.f32.mrb[11].mxu0 }
 0x693   : > { %v1244_v57 = vpop.trf.xlu1 }
 0x694   : > { %1758 = vmatmul.mubr.msk.f32.vlgmr.msra.gmra.mrb[12].mxu0 %vm303_vm0, %v1244_v57 }
 0x695   : > { %1768 = vmatprep.mubr.msk.f32.mxu0 %vm1977_vm1, %v1978_v13 }
 0x767   : > { %v1337_v60 = vpop.f32.mrb[12].mxu0 }
 0x768   : > { %v1338_v61 = vadd.f32 %v1337_v60, %v1267_v59  ;;  %v1759_v62 = vpop.f32.mrb[13].mxu0 }
 0x769   : > { %v1476_v62 = vsub.s32 5, %v2104_v19 }
 0x76a   : > { %v2206_v63 = vadd.f32 %v1338_v61, %v2078_v0  ;;  %v1366_v0 = vld [vmem:[%s2344_s5 + $0x8] sm:$0xff] }
 0x76b   : > { %v1819_v7 = vpack.c.bf16 %v1366_v0, %v1365_v6 }
 0x76c   : > { %v1342_v1 = vsel %vm303_vm0, %v2206_v63, 0.0 }
 0x76d   : > { %1343 = vadd.xlane.f32.xlu0 %v1342_v1  ;;  %1820 = vmatpush3.bf16.msra.mxu0 %v1819_v7  ;;  %v1477_v1 = vrot.slane %v2110_v21, %v1476_v62 }
 0x76e   : > { %1821 = vmatprep.subr.bf16.mxu0 %v1976_v10 }
 0x771   : > { %1823 = vmatpush3.bf16.msra.mxu0 %v1822_v11 }
 0x7fa   : > { %v1344_v2 = vpop.xlane.xlu0 %1343 }
 0x7fb   : > { %v1345_v3 = vmul.f32 0.03125, %v1344_v2 }
 0x7fd   : > { %v1346_v4 = vsub.f32 %v2206_v63, %v1345_v3 }
 0x7ff   : > { %v1347_v5 = vmul.f32 %v1346_v4, %v1346_v4 }
 0x801   : > { %v1348_v13 = vsel %vm303_vm0, %v1347_v5, 0.0 }
 0x802   : > { %1349 = vadd.xlane.f32.xlu0 %v1348_v13 }
 0x88f   : > { %v1350_v16 = vpop.xlane.xlu0 %1349 }
 0x890   : > { %v1351_v17 = vmul.f32 0.03125, %v1350_v16 }
 0x892   : > { %v1352_v18 = vadd.f32 1e-05, %v1351_v17 }
 0x894   : > { %1908 = vrsqrt.f32 %v1352_v18 }
 0x89e   : > { %v1909_v24 = vpop.eup %1908 }
 0x89f   : > { %v1354_v25 = vmul.f32 %v1909_v24, %v1346_v4 }
 0x8a1   : > { %v1359_v27 = vmul.f32 %v1358_v23, %v1354_v25 }
 0x8a3   : > { %v1364_v28 = vadd.f32 %v1363_v26, %v1359_v27 }
 0x8a5   : > { %1769 = vmatmul.mubr.msk.f32.vlgmr.msra.gmra.mrb[14].mxu0 %vm303_vm0, %v1364_v28 }
 0x978   : > { %v1445_v51 = vpop.f32.mrb[14].mxu0 }
 0x979   : > { %v1446_v52 = vadd.f32 %v1644_v50, %v1445_v51  ;;  %v1770_v53 = vpop.f32.mrb[15].mxu0 }
 0x97b   : > { %v1450_v54 = vmul.f32 0.044715, %v1446_v52  ;;  %v1449_v60 = vmul.f32 0.5, %v1446_v52 }
 0x97d   : > { %v1451_v55 = vmul.f32 %v1450_v54, %v1446_v52 }
 0x97f   : > { %v1452_v56 = vmul.f32 %v1451_v55, %v1446_v52 }
 0x981   : > { %v1453_v57 = vadd.f32 %v1452_v56, %v1446_v52 }
 0x983   : > { %v1454_v58 = vmul.f32 0.7978846, %v1453_v57 }
 0x985   : > { %1910 = vtanh.f32 %v1454_v58 }
 0x98f   : > { %v1911_v59 = vpop.eup %1910 }
 0x990   : > { %v1456_v61 = vadd.f32 1.0, %v1911_v59 }
 0x992   : > { %v1457_v10 = vmul.f32 %v1456_v61, %v1449_v60 }
 0x994   : > { %1804 = vmatmul.mubr.f32.vlgmr.msra.gmra.mrb[6].mxu1 %v1457_v10 }
 0xa67   : > { %v1544_v2 = vpop.f32.mrb[6].mxu1 }
 0xa68   : > { %v1545_v3 = vadd.f32 %v1544_v2, %v1477_v1  ;;  %v1805_v4 = vpop.f32.mrb[7].mxu1 }
 0xa6a   : > { %v1548_v5 = vadd.f32 %v1545_v3, %v2206_v63 }
 0xa6c   : > { %1549 = vst.msk [vmem:[%s296_s22] sm:$0xff] %vm303_vm0, %v1548_v5 }
 0xa6d   : > { %1925 = shalt.err (!%p1922_p3)
}
 0xa6e   : > { %s1926_s18 = scalar_lea.hbm %s2296_s26, 128  ;;  %s1930_s21 = scalar_lea.hbm %s2347_s8, 256 }
 0xa6f   : > { %p1927_p4 = scmp.ne.s32.totalorder %s2296_s26, %s1926_s18  ;;  %p1931_p9 = scmp.lt.u32.totalorder %s2296_s26, %s2347_s8 }
 0xa70   : > { %p1932_p10 = scmp.lt.u32.totalorder %s1930_s21, %s1926_s18  ;;  %p1934_p12 = scmp.lt.u32.totalorder %s1926_s18, %s2296_s26 }
 0xa71   : > { %p1928_p7 = pnand %p1927_p4, %p2063_p5 }
 0xa72   : > { %p1933_p11 = por %p1932_p10, %p1931_p9 }
 0xa73   : > { %p1929_p8 = pneg %p1928_p7 }
 0xa74   : > { %p1935_p13 = por %p1934_p12, %p1933_p11 }
 0xa76   : > { %p1936_p0 = pnand %p1935_p13, %p1929_p8 }
 0xa78   : > { %1939 = shalt.err (!%p1936_p0)
}
 0xa79   : > { %1848 = dma.vmem_to_hbm [thread:$0]  (%p2063_p5), %s2298_s23, 128, %s2296_s26, %s1551_s10  }
 0xa7a PF: > { %p1854_p1 = scmp.ge.s32.totalorder %s1974_s30, 2  ;;  %s1576_s25 = sand.u32 1, %s1962_s27  }
 0xa7b   : > { %s1577_s9 = scalar_lea.sflag [#allocation3], %s1576_s25 }
 0xa7c   : > { %p1851_p2 = pnand %p1854_p1, %p2067_p6 }
 0xa7e   : > { %1957 = dma.done.wait (!%p1851_p2), %s1577_s9, 128  }
 0xa7f   : > { %1959 = vsyncadd (!%p1851_p2), %s1577_s9, 4294967168  ;;  %p18_p3 = scmp.ge.s32.totalorder %s2050_s11, 4   ;;  %s2350_s27 = smov %s1966_s28 }
 0xa80   : > { %s2351_s28 = smov %s1970_s29  ;;  %s2352_s29 = smov %s2061_s14 }
 0xa81   : > { %s2353_s30 = smov %s2050_s11  ;;  %20 = sbr.rel (!%p18_p3) target bundleno = 3 (0x3), region = 87 }
 0xa88   :  { %1582 = vsyncpa [#allocation3], 1 }
 0xa89   :  { %1584 = vsyncpa [#allocation3 + $0x1], 1 }

</bundles_post_ra>
